<compile_context>
chip_gen: v5e
topology: v5e:2x2
jax: 0.10.0
libtpu: 0.0.40
codegen_flags: <defaults>
</compile_context>

<pallas_src>
import numpy as np
import jax
import jax.numpy as jnp
from jax import lax
from jax.experimental import pallas as pl
from jax.experimental.pallas import tpu as pltpu

BN_EPS = 1e-5
BN_SCALE = 1.0 / np.sqrt(1.0 + BN_EPS)  # eval-mode BN with synthetic stats (mean=0, var=1, gamma=1, beta=0)

_VMEM_TILE_BUDGET = 16 * 1024 * 1024    # conservative per-call tile budget (fits v5e default)
_VMEM_LIMIT = 32 * 1024 * 1024          # explicit scoped-VMEM limit (safe on v5e/v6e/v7x)


def _round_up(v, m):
    return ((v + m - 1) // m) * m


# ----------------------------------------------------------------------------
# Deterministic parameter init (synthetic weights; shapes follow the PyTorch module)
# ----------------------------------------------------------------------------
def _conv_w(key, cout, cin, k):
    fan = cin * k * k
    return (jax.random.normal(key, (cout, cin, k, k), jnp.float32)
            * np.sqrt(2.0 / fan)).astype(jnp.float32)


# MobileNetV2 (DeepLab variant) inverted-residual setting: (t, c, n, s)
_IR_SETTING = [
    (1, 16, 1, 1),
    (6, 24, 2, 2),
    (6, 32, 3, 2),
    (6, 64, 4, 2),
    (6, 96, 3, 1),
    (6, 160, 3, 2),
    (6, 320, 1, 1),
]


def init_params(key, output_stride=16):
    keys = iter(jax.random.split(key, 128))
    params = {}
    params['stem'] = _conv_w(next(keys), 32, 3, 3)           # conv_bn(3, 32, stride=2)
    blocks = []
    inp = 32
    current_stride = 2
    rate = 1
    for t, c, n, s in _IR_SETTING:
        if current_stride == output_stride:
            stride, dilation = 1, rate
            rate *= s
        else:
            stride, dilation = s, 1
            current_stride *= s
        for i in range(n):
            st = stride if i == 0 else 1
            hidden = int(round(inp * t))
            blk = dict(inp=inp, oup=c, stride=st, dilation=dilation, t=t, hidden=hidden)
            if t != 1:
                blk['pw'] = _conv_w(next(keys), hidden, inp, 1)
            blk['dw'] = _conv_w(next(keys), hidden, 1, 3)      # depthwise
            blk['pwl'] = _conv_w(next(keys), c, hidden, 1)
            blocks.append(blk)
            inp = c
    params['blocks'] = blocks
    # self.reshape_channel = nn.Conv2d(320, 3, 1, stride=1, padding=0, bias=False)
    params['reshape_channel'] = _conv_w(next(keys), 3, 320, 1)
    return params


# ----------------------------------------------------------------------------
# MobileNetV2 backbone (plain-JAX glue; external to the shown module)
# ----------------------------------------------------------------------------
def _conv(x, w, stride=1, padding=0, dilation=1, groups=1):
    return lax.conv_general_dilated(
        x, w, window_strides=(stride, stride),
        padding=((padding, padding), (padding, padding)),
        rhs_dilation=(dilation, dilation),
        feature_group_count=groups,
        dimension_numbers=('NCHW', 'OIHW', 'NCHW'))


def _bn(x):
    return x * BN_SCALE


def _relu6(x):
    return jnp.clip(x, 0.0, 6.0)


def _fixed_padding(x, k, dilation):
    keff = k + (k - 1) * (dilation - 1)
    pt = keff - 1
    pb = pt // 2
    pe = pt - pb
    return jnp.pad(x, ((0, 0), (0, 0), (pb, pe), (pb, pe)))


def _inverted_residual(blk, x):
    y = _fixed_padding(x, 3, blk['dilation'])
    if blk['t'] != 1:
        y = _relu6(_bn(_conv(y, blk['pw'])))
    y = _relu6(_bn(_conv(y, blk['dw'], stride=blk['stride'],
                         dilation=blk['dilation'], groups=blk['hidden'])))
    y = _bn(_conv(y, blk['pwl']))
    if blk['stride'] == 1 and blk['inp'] == blk['oup']:
        y = x + y
    return y


def mobilenet_v2_backbone(params, x):
    y = _relu6(_bn(_conv(x, params['stem'], stride=2, padding=1)))
    low_level_feat = None
    for idx, blk in enumerate(params['blocks']):
        y = _inverted_residual(blk, y)
        if idx == 2:                       # features[0:4] boundary -> 24ch @ stride 4
            low_level_feat = y
    # TODO(synk): exact `domain_info` tap of the customised MobileNetV2 is not provided;
    # use the 320-channel stride-16 high-level feature (consistent with Conv2d(320, 3, 1)).
    domain_info = y
    return y, low_level_feat, domain_info


# ----------------------------------------------------------------------------
# Bilinear x16 interpolation matrix (PyTorch align_corners=False semantics).
# Row/col 1-D operators only — the dense Kronecker product is never formed.
# ----------------------------------------------------------------------------
def _bilinear_matrix(out_size, in_size, scale):
    dst = np.arange(out_size, dtype=np.float64)
    src = (dst + 0.5) / scale - 0.5
    src = np.maximum(src, 0.0)
    i0 = np.minimum(np.floor(src).astype(np.int64), in_size - 1)
    lam = src - i0
    i1 = np.minimum(i0 + 1, in_size - 1)
    A = np.zeros((out_size, in_size), dtype=np.float32)
    A[np.arange(out_size), i0] += (1.0 - lam).astype(np.float32)
    A[np.arange(out_size), i1] += lam.astype(np.float32)
    return jnp.asarray(A)


# ----------------------------------------------------------------------------
# Tile-size selection (resolution-robust, VMEM-budgeted)
# ----------------------------------------------------------------------------
def _choose_spatial_tile(hw):
    """Lane tile for the 1x1 conv: multiple of 128, <= 4096, >= 2 tiles when possible."""
    if hw <= 128:
        return hw                                     # full-dim block (allowed by tiling rule)
    ts = min(4096, _round_up(-(-hw // 2), 128))       # aim for at least 2 tiles
    return min(ts, _round_up(hw, 128))


def _choose_col_tile(wo):
    """Output-column tile for the upsample: full Wo, or a balanced multiple of 128 <= 2048."""
    if wo <= 2048:
        return wo
    c = -(-wo // 2048)
    return _round_up(-(-wo // c), 128)


def _choose_row_tile(h, w, ho, two, cout):
    """Output-row tile: VMEM-budgeted, multiple of 16, <= 512, >= 2 row tiles when Ho >= 32."""
    # double-buffered blocks that don't scale with TH
    fixed = 2 * cout * h * w * 4 + 2 * w * two * 2
    # bytes per output row: double-buffered out block + in-kernel dot temp + A_rows + 'rows' temp
    per_row = 2 * cout * two * 4 + cout * two * 4 + 4 * h + 6 * w
    th = max((_VMEM_TILE_BUDGET - fixed) // per_row, 16)
    th = min(th, 512)                                  # diminishing returns beyond ~512 rows
    if ho >= 32:
        th = min(th, ho // 2)                          # >= 2 row tiles (pipeline + v7x TC split)
    th = max(16, (th // 16) * 16)
    return int(min(th, ho))


# ----------------------------------------------------------------------------
# Pallas kernel 1: 1x1 conv (320 -> 3), channel-major, lane dim = flattened spatial tile
# ----------------------------------------------------------------------------
def _conv1x1_kernel(d_ref, wc_ref, o_ref):
    # d_ref : (1, Cin, TS)  bf16 stride-16 feature tile, NCHW-flat (channel-major)
    # wc_ref: (Cout, Cin)   reshape_channel weight (no bias), bf16
    # o_ref : (1, Cout, TS) channel-major 3-channel feature tile, f32
    o_ref[0] = jnp.dot(wc_ref[...], d_ref[0], preferred_element_type=jnp.float32)


# ----------------------------------------------------------------------------
# Pallas kernel 2: separable x16 bilinear upsample, tiled over output rows (and columns
# for very wide images).
#   out[c] = A_rows_tile (TH,h) @ y[c] (h,w) @ A_colsT_tile (w,TWo)
# Output block (1, Cout, TH, TWo) is lane-dense (last dim TWo) and already NCHW.
# ----------------------------------------------------------------------------
def _bilinear_up_kernel(y_ref, ar_ref, act_ref, o_ref):
    # y_ref  : (1, Cout, h, w)     3-channel feature (constant across row/col tile axes)
    # ar_ref : (TH, h)             row-interpolation tile (bf16, exact n/32 weights)
    # act_ref: (w, TWo)            column-interpolation tile, transposed (bf16)
    # o_ref  : (1, Cout, TH, TWo)  f32
    ar = ar_ref[...]
    act = act_ref[...]
    cout = y_ref.shape[1]
    for c in range(cout):                                               # Cout == 3, static
        yc = y_ref[0, c].astype(jnp.bfloat16)                           # (h, w)
        rows = jnp.dot(ar, yc, preferred_element_type=jnp.float32)      # (TH, w)
        o_ref[0, c] = jnp.dot(rows.astype(jnp.bfloat16), act,
                              preferred_element_type=jnp.float32)       # (TH, TWo)


def deeplab_ema_forward(params, x):
    # Backbone (plain-JAX glue): NCHW in, (N, 320, h, w) out with h = H/16, w = W/16.
    _, _, domain_info = mobilenet_v2_backbone(params, x)
    N, Cin, h, w = domain_info.shape
    scale = 16
    Ho, Wo = h * scale, w * scale
    wc4 = params['reshape_channel']                 # (3, 320, 1, 1)
    Cout = wc4.shape[0]
    hw = h * w

    # ---- Pallas call 1: 1x1 conv, channel-major, spatially tiled, bf16 ingress ----
    d_flat = domain_info.reshape(N, Cin, hw).astype(jnp.bfloat16)   # cast fuses into backbone
    wc = wc4.reshape(Cout, Cin).astype(jnp.bfloat16)

    TS = _choose_spatial_tile(hw)
    S = pl.cdiv(hw, TS)

    conv_cost = pl.CostEstimate(
        flops=2 * N * Cout * Cin * hw,
        transcendentals=0,
        bytes_accessed=N * Cin * hw * 2 + Cout * Cin * 2 + N * Cout * hw * 4)

    y_flat = pl.pallas_call(
        _conv1x1_kernel,
        out_shape=jax.ShapeDtypeStruct((N, Cout, hw), jnp.float32),
        grid=(N, S),
        in_specs=[
            pl.BlockSpec((1, Cin, TS), lambda n, s: (n, 0, s)),
            pl.BlockSpec((Cout, Cin), lambda n, s: (0, 0)),
        ],
        out_specs=pl.BlockSpec((1, Cout, TS), lambda n, s: (n, 0, s)),
        compiler_params=pltpu.CompilerParams(
            dimension_semantics=("parallel", "parallel"),
            vmem_limit_bytes=_VMEM_LIMIT),
        cost_estimate=conv_cost,
    )(d_flat, wc)

    # ---- Pallas call 2: separable x16 bilinear upsample, row (and column) tiled ----
    y4 = y_flat.reshape(N, Cout, h, w)                                  # free XLA view
    A_rows = _bilinear_matrix(Ho, h, scale).astype(jnp.bfloat16)        # (Ho, h)
    A_colsT = _bilinear_matrix(Wo, w, scale).T.astype(jnp.bfloat16)     # (w, Wo)

    TWo = _choose_col_tile(Wo)
    C = pl.cdiv(Wo, TWo)
    TH = _choose_row_tile(h, w, Ho, TWo, Cout)
    R = pl.cdiv(Ho, TH)

    up_cost = pl.CostEstimate(
        flops=2 * N * Cout * (Ho * h * w + Ho * w * Wo),
        transcendentals=0,
        bytes_accessed=(N * Cout * hw * 4 + Ho * h * 2 + w * Wo * 2
                        + N * Cout * Ho * Wo * 4))

    out = pl.pallas_call(
        _bilinear_up_kernel,
        out_shape=jax.ShapeDtypeStruct((N, Cout, Ho, Wo), jnp.float32),
        grid=(N, R, C),
        in_specs=[
            pl.BlockSpec((1, Cout, h, w), lambda n, r, c: (n, 0, 0, 0)),  # resident across r, c
            pl.BlockSpec((TH, h), lambda n, r, c: (r, 0)),
            pl.BlockSpec((w, TWo), lambda n, r, c: (0, c)),
        ],
        out_specs=pl.BlockSpec((1, Cout, TH, TWo), lambda n, r, c: (n, 0, r, c)),
        compiler_params=pltpu.CompilerParams(
            dimension_semantics=("parallel", "parallel", "parallel"),
            vmem_limit_bytes=_VMEM_LIMIT),
        cost_estimate=up_cost,
    )(y4, A_rows, A_colsT)

    # Already NCHW (N, 3, 16H, 16W): no trailing transpose needed.
    return out


if __name__ == "__main__":
    key = jax.random.PRNGKey(0)
    pkey, xkey = jax.random.split(key)
    params = init_params(pkey)

    # Small input consistent with the module: NCHW, 3-channel image, divisible by 16.
    x = jax.random.normal(xkey, (2, 3, 64, 64), jnp.float32)

    fwd = jax.jit(lambda inp: deeplab_ema_forward(params, inp))
    out = fwd(x)
    out = jax.block_until_ready(out)

    assert out.shape == (2, 3, 64, 64), out.shape
    assert bool(jnp.all(jnp.isfinite(out)))
    print("KERNEL_OK")
</pallas_src>

<mosaic_0001>
module attributes {stable_mosaic.version = 11 : i64} {
  func.func @_conv1x1_kernel(%arg0: i32, %arg1: i32, %arg2: memref<1x320x16xbf16, #tpu.memory_space<vmem>>, %arg3: memref<3x320xbf16, #tpu.memory_space<vmem>>, %arg4: memref<1x3x16xf32, #tpu.memory_space<vmem>>) attributes {dimension_semantics = [#tpu.dimension_semantics<parallel>, #tpu.dimension_semantics<parallel>], iteration_bounds = array<i64: 2, 1>, scalar_prefetch = 0 : i64, scratch_operands = 0 : i64, tpu.core_type = #tpu.core_type<tc>, window_params = [{transform_indices = @transform_0, window_bounds = array<i64: 1, 320, 16>}, {pipeline_mode = #tpu.pipeline_mode<synchronous>, transform_indices = @transform_1, window_bounds = array<i64: 3, 320>}, {transform_indices = @transform_2, window_bounds = array<i64: 1, 3, 16>}]} {
    %c0 = arith.constant 0 : index
    %c0_0 = arith.constant 0 : index
    %0 = vector.load %arg3[%c0, %c0_0] : memref<3x320xbf16, #tpu.memory_space<vmem>>, vector<3x320xbf16>
    %c0_1 = arith.constant 0 : index
    %c0_2 = arith.constant 0 : index
    %c0_3 = arith.constant 0 : index
    %1 = vector.load %arg2[%c0_1, %c0_2, %c0_3] : memref<1x320x16xbf16, #tpu.memory_space<vmem>>, vector<1x320x16xbf16>
    %2 = vector.shape_cast %1 : vector<1x320x16xbf16> to vector<320x16xbf16>
    %cst = arith.constant dense<0.000000e+00> : vector<3x16xf32>
    %3 = tpu.matmul %0, %2, %cst {dimension_numbers = #tpu.dot_dimension_numbers<[1], [0], [0], [1], [0, 0, 1, 1], [], []>} : vector<3x320xbf16>, vector<320x16xbf16>, vector<3x16xf32> -> vector<3x16xf32>
    %c0_4 = arith.constant 0 : index
    %c0_5 = arith.constant 0 : index
    %c0_6 = arith.constant 0 : index
    %4 = vector.load %arg4[%c0_4, %c0_5, %c0_6] : memref<1x3x16xf32, #tpu.memory_space<vmem>>, vector<1x3x16xf32>
    %5 = vector.shape_cast %4 : vector<1x3x16xf32> to vector<3x16xf32>
    %6 = vector.shape_cast %3 : vector<3x16xf32> to vector<1x3x16xf32>
    tpu.vector_store %arg4[%c0_4, %c0_5, %c0_6], %6 {strides = array<i32>} : memref<1x3x16xf32, #tpu.memory_space<vmem>>, vector<1x3x16xf32>,
    return
  }
  func.func @transform_0(%arg0: i32, %arg1: i32) -> (i32, i32, i32) {
    %c0_i32 = arith.constant 0 : i32
    %c0_i32_0 = arith.constant 0 : i32
    return %arg0, %c0_i32, %arg1 : i32, i32, i32
  }
  func.func @transform_1(%arg0: i32, %arg1: i32) -> (i32, i32) {
    %c0_i32 = arith.constant 0 : i32
    %c0_i32_0 = arith.constant 0 : i32
    %c0_i32_1 = arith.constant 0 : i32
    return %c0_i32, %c0_i32_0 : i32, i32
  }
  func.func @transform_2(%arg0: i32, %arg1: i32) -> (i32, i32, i32) {
    %c0_i32 = arith.constant 0 : i32
    %c0_i32_0 = arith.constant 0 : i32
    return %arg0, %c0_i32, %arg1 : i32, i32, i32
  }
}

module attributes {stable_mosaic.version = 11 : i64} {
  func.func @_bilinear_up_kernel(%arg0: i32, %arg1: i32, %arg2: i32, %arg3: memref<1x3x4x4xf32, #tpu.memory_space<vmem>>, %arg4: memref<32x4xbf16, #tpu.memory_space<vmem>>, %arg5: memref<4x64xbf16, #tpu.memory_space<vmem>>, %arg6: memref<1x3x32x64xf32, #tpu.memory_space<vmem>>) attributes {dimension_semantics = [#tpu.dimension_semantics<parallel>, #tpu.dimension_semantics<parallel>, #tpu.dimension_semantics<parallel>], iteration_bounds = array<i64: 2, 2, 1>, scalar_prefetch = 0 : i64, scratch_operands = 0 : i64, tpu.core_type = #tpu.core_type<tc>, window_params = [{transform_indices = @transform_0, window_bounds = array<i64: 1, 3, 4, 4>}, {transform_indices = @transform_1, window_bounds = array<i64: 32, 4>}, {transform_indices = @transform_2, window_bounds = array<i64: 4, 64>}, {transform_indices = @transform_3, window_bounds = array<i64: 1, 3, 32, 64>}]} {
    %c0 = arith.constant 0 : index
    %c0_0 = arith.constant 0 : index
    %0 = vector.load %arg4[%c0, %c0_0] : memref<32x4xbf16, #tpu.memory_space<vmem>>, vector<32x4xbf16>
    %c0_1 = arith.constant 0 : index
    %c0_2 = arith.constant 0 : index
    %1 = vector.load %arg5[%c0_1, %c0_2] : memref<4x64xbf16, #tpu.memory_space<vmem>>, vector<4x64xbf16>
    %c0_3 = arith.constant 0 : index
    %c0_4 = arith.constant 0 : index
    %c0_5 = arith.constant 0 : index
    %c0_6 = arith.constant 0 : index
    %2 = vector.load %arg3[%c0_3, %c0_4, %c0_5, %c0_6] : memref<1x3x4x4xf32, #tpu.memory_space<vmem>>, vector<1x1x4x4xf32>
    %3 = vector.shape_cast %2 : vector<1x1x4x4xf32> to vector<4x4xf32>
    %4 = arith.truncf %3 : vector<4x4xf32> to vector<4x4xbf16>
    %cst = arith.constant dense<0.000000e+00> : vector<32x4xf32>
    %5 = tpu.matmul %0, %4, %cst {dimension_numbers = #tpu.dot_dimension_numbers<[1], [0], [0], [1], [0, 0, 1, 1], [], []>} : vector<32x4xbf16>, vector<4x4xbf16>, vector<32x4xf32> -> vector<32x4xf32>
    %6 = arith.truncf %5 : vector<32x4xf32> to vector<32x4xbf16>
    %cst_7 = arith.constant dense<0.000000e+00> : vector<32x64xf32>
    %7 = tpu.matmul %6, %1, %cst_7 {dimension_numbers = #tpu.dot_dimension_numbers<[1], [0], [0], [1], [0, 0, 1, 1], [], []>} : vector<32x4xbf16>, vector<4x64xbf16>, vector<32x64xf32> -> vector<32x64xf32>
    %c0_8 = arith.constant 0 : index
    %c0_9 = arith.constant 0 : index
    %c0_10 = arith.constant 0 : index
    %c0_11 = arith.constant 0 : index
    %8 = vector.load %arg6[%c0_8, %c0_9, %c0_10, %c0_11] : memref<1x3x32x64xf32, #tpu.memory_space<vmem>>, vector<1x1x32x64xf32>
    %9 = vector.shape_cast %8 : vector<1x1x32x64xf32> to vector<32x64xf32>
    %10 = vector.shape_cast %7 : vector<32x64xf32> to vector<1x1x32x64xf32>
    tpu.vector_store %arg6[%c0_8, %c0_9, %c0_10, %c0_11], %10 {strides = array<i32>} : memref<1x3x32x64xf32, #tpu.memory_space<vmem>>, vector<1x1x32x64xf32>,
    %c0_12 = arith.constant 0 : index
    %c1 = arith.constant 1 : index
    %c0_13 = arith.constant 0 : index
    %c0_14 = arith.constant 0 : index
    %11 = vector.load %arg3[%c0_12, %c1, %c0_13, %c0_14] : memref<1x3x4x4xf32, #tpu.memory_space<vmem>>, vector<1x1x4x4xf32>
    %12 = vector.shape_cast %11 : vector<1x1x4x4xf32> to vector<4x4xf32>
    %13 = arith.truncf %12 : vector<4x4xf32> to vector<4x4xbf16>
    %cst_15 = arith.constant dense<0.000000e+00> : vector<32x4xf32>
    %14 = tpu.matmul %0, %13, %cst_15 {dimension_numbers = #tpu.dot_dimension_numbers<[1], [0], [0], [1], [0, 0, 1, 1], [], []>} : vector<32x4xbf16>, vector<4x4xbf16>, vector<32x4xf32> -> vector<32x4xf32>
    %15 = arith.truncf %14 : vector<32x4xf32> to vector<32x4xbf16>
    %cst_16 = arith.constant dense<0.000000e+00> : vector<32x64xf32>
    %16 = tpu.matmul %15, %1, %cst_16 {dimension_numbers = #tpu.dot_dimension_numbers<[1], [0], [0], [1], [0, 0, 1, 1], [], []>} : vector<32x4xbf16>, vector<4x64xbf16>, vector<32x64xf32> -> vector<32x64xf32>
    %c0_17 = arith.constant 0 : index
    %c1_18 = arith.constant 1 : index
    %c0_19 = arith.constant 0 : index
    %c0_20 = arith.constant 0 : index
    %17 = vector.load %arg6[%c0_17, %c1_18, %c0_19, %c0_20] : memref<1x3x32x64xf32, #tpu.memory_space<vmem>>, vector<1x1x32x64xf32>
    %18 = vector.shape_cast %17 : vector<1x1x32x64xf32> to vector<32x64xf32>
    %19 = vector.shape_cast %16 : vector<32x64xf32> to vector<1x1x32x64xf32>
    tpu.vector_store %arg6[%c0_17, %c1_18, %c0_19, %c0_20], %19 {strides = array<i32>} : memref<1x3x32x64xf32, #tpu.memory_space<vmem>>, vector<1x1x32x64xf32>,
    %c0_21 = arith.constant 0 : index
    %c2 = arith.constant 2 : index
    %c0_22 = arith.constant 0 : index
    %c0_23 = arith.constant 0 : index
    %20 = vector.load %arg3[%c0_21, %c2, %c0_22, %c0_23] : memref<1x3x4x4xf32, #tpu.memory_space<vmem>>, vector<1x1x4x4xf32>
    %21 = vector.shape_cast %20 : vector<1x1x4x4xf32> to vector<4x4xf32>
    %22 = arith.truncf %21 : vector<4x4xf32> to vector<4x4xbf16>
    %cst_24 = arith.constant dense<0.000000e+00> : vector<32x4xf32>
    %23 = tpu.matmul %0, %22, %cst_24 {dimension_numbers = #tpu.dot_dimension_numbers<[1], [0], [0], [1], [0, 0, 1, 1], [], []>} : vector<32x4xbf16>, vector<4x4xbf16>, vector<32x4xf32> -> vector<32x4xf32>
    %24 = arith.truncf %23 : vector<32x4xf32> to vector<32x4xbf16>
    %cst_25 = arith.constant dense<0.000000e+00> : vector<32x64xf32>
    %25 = tpu.matmul %24, %1, %cst_25 {dimension_numbers = #tpu.dot_dimension_numbers<[1], [0], [0], [1], [0, 0, 1, 1], [], []>} : vector<32x4xbf16>, vector<4x64xbf16>, vector<32x64xf32> -> vector<32x64xf32>
    %c0_26 = arith.constant 0 : index
    %c2_27 = arith.constant 2 : index
    %c0_28 = arith.constant 0 : index
    %c0_29 = arith.constant 0 : index
    %26 = vector.load %arg6[%c0_26, %c2_27, %c0_28, %c0_29] : memref<1x3x32x64xf32, #tpu.memory_space<vmem>>, vector<1x1x32x64xf32>
    %27 = vector.shape_cast %26 : vector<1x1x32x64xf32> to vector<32x64xf32>
    %28 = vector.shape_cast %25 : vector<32x64xf32> to vector<1x1x32x64xf32>
    tpu.vector_store %arg6[%c0_26, %c2_27, %c0_28, %c0_29], %28 {strides = array<i32>} : memref<1x3x32x64xf32, #tpu.memory_space<vmem>>, vector<1x1x32x64xf32>,
    return
  }
  func.func @transform_0(%arg0: i32, %arg1: i32, %arg2: i32) -> (i32, i32, i32, i32) {
    %c0_i32 = arith.constant 0 : i32
    %c0_i32_0 = arith.constant 0 : i32
    %c0_i32_1 = arith.constant 0 : i32
    %c0_i32_2 = arith.constant 0 : i32
    return %arg0, %c0_i32, %c0_i32_0, %c0_i32_1 : i32, i32, i32, i32
  }
  func.func @transform_1(%arg0: i32, %arg1: i32, %arg2: i32) -> (i32, i32) {
    %c0_i32 = arith.constant 0 : i32
    %c0_i32_0 = arith.constant 0 : i32
    return %arg1, %c0_i32 : i32, i32
  }
  func.func @transform_2(%arg0: i32, %arg1: i32, %arg2: i32) -> (i32, i32) {
    %c0_i32 = arith.constant 0 : i32
    %c0_i32_0 = arith.constant 0 : i32
    return %c0_i32, %arg2 : i32, i32
  }
  func.func @transform_3(%arg0: i32, %arg1: i32, %arg2: i32) -> (i32, i32, i32, i32) {
    %c0_i32 = arith.constant 0 : i32
    %c0_i32_0 = arith.constant 0 : i32
    return %arg0, %c0_i32, %arg1, %arg2 : i32, i32, i32, i32
  }
}

</mosaic_0001>

<bundles_post_ra>
// kernel: _lambda_.2
= control target key start
LH: loop header
LB: loop body
LE: loop exit
PB: predicated region body
PF: predicated region fallthrough
CT: control target
= control target key end

     0   :  { %s637_s9 = smov 0   ;;  %s639_s10 = smov 0   ;;  %s699_s0 = inlined_call_operand.vmem [shape: bf16[2,320,16], index: 0, kind: input, shape index: {}]   ;;  %s700_s1 = inlined_call_operand.vmem [shape: bf16[3,320], index: 1, kind: input, shape index: {}]   ;;  %s701_s2 = inlined_call_operand.vmem [shape: f32[2,3,16], index: 2, kind: output, shape index: {}]  }
   0x1   :  { %s641_s11 = smov 0  }
   0x2 LB: > { %s24_s12 = sadd.s32 1, %s616_s10  ;;  %p467_p0 = scmp.ge.s32.totalorder %s620_s11, 1  ;;  %s620_s11 = sphi %s641_s11, %s12_s11   ;;  %s616_s10 = sphi %s639_s10, %s703_s10   ;;  %s612_s9 = sphi %s637_s9, %s702_s9  }
   0x3   : > { %p26_p1 = scmp.ge.s32.totalorder %s24_s12, 2  ;;  %p131_p2 = scmp.lt.s32.totalorder %s620_s11, 3 }
   0x5   : > { %s705_s12 = smov (%p26_p1, %s24_s12), 0  ;;  %p132_p3 = pnand %p467_p0, %p131_p2 }
   0x6   : > { %p158_p4 = scmp.lt.s32.totalorder (!%p132_p3), %s612_s9, 1 }
   0x7   : > { %135 = sbr.rel (%p132_p3) target bundleno = 183 (0xb7), region = 28 }
   0xc   : > { %v174_v0 = vld [vmem:[%s700_s1] sm:$0x3f]  ;;  %s707_s9 = smov (!%p158_p4, %s612_s9), 1  ;;  %vm342_vm0 = vcmask 523264   ;;  %vm384_vm1 = vcmask 124928  }
   0xd   : > { %216 = vst [vmem:[#allocation1] ss:$4 sm:$0xff] %v174_v0  ;;  %s573_s15 = smul.u32 160, %s707_s9  ;;  %s469_s19 = sshll.u32 %s707_s9, 2 }
   0xe   : > { %s172_s22 = scalar_lea.vmem %s701_s2, %s469_s19 }
   0xf   : > { %s664_s18 = scalar_lea.vmem %s699_s0, %s573_s15 }
  0x10   : > { %v560_v1 = vld [vmem:[%s664_s18 + $0x38] sm:$0xff]  ;;  %v559_v4 = vld [vmem:[%s664_s18 + $0x30] sm:$0xff]  ;;  %v558_v7 = vld [vmem:[%s664_s18 + $0x28] sm:$0xff] }
  0x11   : > { %v568_v2 = vld [vmem:[%s664_s18 + $0x78] sm:$0xff]  ;;  %345 = vmatpush.bf16.msra.mxu0 %v560_v1  ;;  %v567_v5 = vld [vmem:[%s664_s18 + $0x70] sm:$0xff]  ;;  %v566_v8 = vld [vmem:[%s664_s18 + $0x68] sm:$0xff] }
  0x12   : > { %v572_v3 = vld [vmem:[%s664_s18 + $0x98] sm:$0xff]  ;;  %358 = vmatpush.bf16.msra.mxu1 %v568_v2  ;;  %v571_v6 = vld [vmem:[%s664_s18 + $0x90] sm:$0xff]  ;;  %v570_v9 = vld [vmem:[%s664_s18 + $0x88] sm:$0xff] }
  0x13   : > { %375 = vmatpush.bf16.msra.mxu2 %v572_v3  ;;  %v557_v10 = vld [vmem:[%s664_s18 + $0x20] sm:$0xff]  ;;  %v556_v13 = vld [vmem:[%s664_s18 + $0x18] sm:$0xff]  ;;  %v555_v16 = vld [vmem:[%s664_s18 + $0x10] sm:$0xff] }
  0x14   : > { %v565_v11 = vld [vmem:[%s664_s18 + $0x60] sm:$0xff]  ;;  %v564_v14 = vld [vmem:[%s664_s18 + $0x58] sm:$0xff]  ;;  %v219_v15 = vld.sshfl [vmem:[#allocation1 + $0x10] sm:$0xff pattern:$0x73625140] }
  0x15   : > { %346 = vmatpush.bf16.msra.mxu0 %v559_v4  ;;  %v569_v12 = vld [vmem:[%s664_s18 + $0x80] sm:$0xff]  ;;  %v563_v17 = vld [vmem:[%s664_s18 + $0x50] sm:$0xff]  ;;  %v554_v18 = vld [vmem:[%s664_s18 + $0x8] sm:$0xff] }
  0x16   : > { %359 = vmatpush.bf16.msra.mxu1 %v567_v5  ;;  %v562_v19 = vld [vmem:[%s664_s18 + $0x48] sm:$0xff]  ;;  %v553_v20 = vld [vmem:[%s664_s18] sm:$0xff] }
  0x17   : > { %376 = vmatpush.bf16.msra.mxu2 %v571_v6  ;;  %v561_v21 = vld [vmem:[%s664_s18 + $0x40] sm:$0xff]  ;;  %v218_v23 = vld.sshfl [vmem:[#allocation1 + $0x8] sm:$0xff pattern:$0x73625140] }
  0x18   : > { %v217_v22 = vld.sshfl [vmem:[#allocation1] sm:$0xff pattern:$0x73625140] }
  0x19   : > { %347 = vmatpush.bf16.msra.mxu0 %v558_v7 }
  0x1a   : > { %360 = vmatpush.bf16.msra.mxu1 %v566_v8 }
  0x1b   : > { %377 = vmatpush.bf16.msra.mxu2 %v570_v9 }
  0x1d   : > { %348 = vmatpush.bf16.msra.mxu0 %v557_v10 }
  0x1e   : > { %361 = vmatpush.bf16.msra.mxu1 %v565_v11 }
  0x1f   : > { %378 = vmatpush.bf16.msra.mxu2 %v569_v12 }
  0x21   : > { %349 = vmatpush.bf16.msra.mxu0 %v556_v13 }
  0x22   : > { %362 = vmatpush.bf16.msra.mxu1 %v564_v14  ;;  %550 = vmatmul.msk.bf16.vlgmr.msra.gmra.mxu2 %vm342_vm0, %v219_v15 }
  0x25   : > { %350 = vmatpush.bf16.msra.mxu0 %v555_v16 }
  0x26   : > { %363 = vmatpush.bf16.msra.mxu1 %v563_v17 }
  0x29   : > { %351 = vmatpush.bf16.msra.mxu0 %v554_v18 }
  0x2a   : > { %364 = vmatpush.bf16.msra.mxu1 %v562_v19 }
  0x2d   : > { %352 = vmatpush.bf16.msra.mxu0 %v553_v20 }
  0x2e   : > { %365 = vmatpush.bf16.msra.mxu1 %v561_v21 }
  0x30   : > { %353 = vmatmul.bf16.vlgmr.msra.gmra.mxu0 %v217_v22 }
  0x31   : > { %366 = vmatmul.bf16.vlgmr.msra.gmra.mxu1 %v218_v23 }
  0xa5   : > { %v380_v24 = vpop.f32.mrf.mxu2 }
  0xad   : > { %v354_v25 = vpop.f32.mrf.mxu0  ;;  %v382_v28 = vpop.f32.mrf.mxu2 }
  0xae   : > { %v367_v26 = vpop.f32.mrf.mxu1 }
  0xaf   : > { %v368_v27 = vadd.f32 %v367_v26, %v354_v25 }
  0xb1   : > { %v381_v29 = vadd.f32 %v380_v24, %v368_v27 }
  0xb3   : > { %385 = vst.msk [vmem:[%s172_s22] sm:$0x7] %vm384_vm1, %v381_v29 }
  0xb5   : > { %v356_v30 = vpop.f32.mrf.mxu0 }
  0xb6   : > { %v369_v31 = vpop.f32.mrf.mxu1 }
  0xb7 PF: > { %s12_s11 = sadd.s32 1, %s620_s11   ;;  %s702_s9 = smov %s616_s10 }
  0xb8   : > { %p9_p5 = scmp.ge.s32.totalorder %s12_s11, 4   ;;  %s703_s10 = smov %s705_s12 }
  0xba   :  { %11 = sbr.rel (!%p9_p5) target bundleno = 2 (0x2), region = 58 }

// kernel: _lambda_.3
= control target key start
LH: loop header
LB: loop body
LE: loop exit
PB: predicated region body
PF: predicated region fallthrough
CT: control target
= control target key end

     0   :  { %8 = vsyncpa [#allocation3], 0  ;;  %s974_s0 = inlined_call_operand.vmem [shape: f32[2,3,4,4], index: 0, kind: input, shape index: {}]   ;;  %s975_s1 = inlined_call_operand.vmem [shape: bf16[64,4], index: 1, kind: input, shape index: {}]   ;;  %s976_s2 = inlined_call_operand.vmem [shape: bf16[4,64], index: 2, kind: input, shape index: {}]   ;;  %s977_s3 = inlined_call_operand.hbm [shape: f32[2,3,64,64], index: 3, kind: output, shape index: {}]  }
   0x1   :  { %10 = vsyncpa [#allocation3 + $0x1], 0  ;;  %s807_s12 = smov 0   ;;  %s809_s13 = smov 0  }
   0x2   :  { %s811_s14 = smov 0   ;;  %s813_s15 = smov 0  }
   0x3   :  { %s815_s16 = smov 0   ;;  %s817_s17 = smov 0  }
   0x4   :  { %s819_s18 = smov 0   ;;  %s821_s19 = smov 0  }
   0x5 LB: > { %s578_s20 = sadd.s32 4294967295, %s778_s19   ;;  %s579_s21 = sadd.s32 4294967294, %s778_s19   ;;  %s778_s19 = sphi %s821_s19, %s16_s19   ;;  %s774_s18 = sphi %s819_s18, %s986_s18   ;;  %s770_s17 = sphi %s817_s17, %s985_s17   ;;  %s766_s16 = sphi %s815_s16, %s984_s16   ;;  %s762_s15 = sphi %s813_s15, %s983_s15   ;;  %s758_s14 = sphi %s811_s14, %s982_s14   ;;  %s754_s13 = sphi %s809_s13, %s981_s13   ;;  %s750_s12 = sphi %s807_s12, %s980_s12  }
   0x6   : > { %s31_s22 = sadd.s32 1, %s770_s17  ;;  %s35_s23 = sadd.s32 1, %s774_s18 }
   0x7   : > { %p33_p0 = scmp.ge.s32.totalorder %s31_s22, 2  ;;  %p134_p1 = scmp.ne.s32.totalorder %s758_s14, %s754_s13 }
   0x8   : > { %p135_p2 = scmp.eq.s32.totalorder %s578_s20, 3  ;;  %p140_p5 = scmp.ne.s32.totalorder %s754_s13, %s750_s12 }
   0x9   : > { %s988_s22 = smov (%p33_p0, %s31_s22), 0  ;;  %s990_s23 = smov (!%p33_p0, %s35_s23), %s774_s18 }
   0xa   : > { %s118_s24 = ssub.s32 %s770_s17, %s988_s22  ;;  %p858_p3 = por %p135_p2, %p134_p1 }
   0xb   : > { %p37_p4 = scmp.ge.s32.totalorder %s990_s23, 2  ;;  %p141_p6 = scmp.eq.s32.totalorder %s579_s21, 3 }
   0xc   : > { %p583_p7 = scmp.ge.s32.totalorder %s778_s19, 1  ;;  %p183_p9 = scmp.lt.s32.totalorder %s778_s19, 5 }
   0xd   : > { %s992_s23 = smov (%p37_p4, %s990_s23), 0  ;;  %p867_p8 = por %p141_p6, %p140_p5 }
   0xe   : > { %s117_s27 = ssub.s32 %s774_s18, %s992_s23  ;;  %s124_s28 = sadd.s32 1, %s758_s14 }
   0xf   : > { %s119_s29 = sor.u32 %s118_s24, %s117_s27  ;;  %p184_p10 = pnand %p583_p7, %p183_p9 }
  0x10   : > { %p122_p11 = scmp.eq.s32.totalorder %s119_s29, 0  ;;  %p216_p12 = scmp.lt.s32.totalorder (!%p184_p10), %s766_s16, 1 }
  0x11   : > { %187 = sbr.rel (%p184_p10) target bundleno = 360 (0x168), region = 32  ;;  %s880_s4 = sshll.u32 (!%p184_p10), %s762_s15, 2 }
  0x12   : > { %s876_s30 = scalar_select %p122_p11, %s758_s14, %s124_s28  }
  0x13   : > { %p222_p13 = scmp.lt.s32.totalorder (!%p184_p10), %s880_s4, 7  ;;  %s213_s28 = sand.u32 (!%p184_p10), 1, %s754_s13  }
  0x14   : > { %s625_s29 = smul.u32 (!%p184_p10), 96, %s213_s28 }
  0x16   : > { %s217_s5 = scalar_select %p216_p12, %s766_s16, 1  ;;  %vm257_vm0 = vcmask 1041408   ;;  %vm250_vm1 = vcmask 31744   ;;  %v237_v11 = vld [vmem:[%s976_s2] sm:$0x3]  ;;  %vm310_vm2 = vcmask 523264  }
  0x17   : > { %s223_s6 = scalar_select %p222_p13, %s880_s4, 7  ;;  %v289_v12 = vsel %vm257_vm0, %v237_v11, 0 }
  0x18   : > { %s626_s7 = smul.u32 12, %s217_s5  ;;  %298 = vmatpush.bf16.msra.mxu1 %v289_v12  ;;  %624 = vmatpush.bf16.msra.mxu3 %v289_v12  ;;  %s215_s5 = scalar_lea.vmem [#allocation2], %s625_s29 }
  0x19   : > { %s586_s8 = sshll.u32 %s223_s6, 2  ;;  %s430_s6 = scalar_lea.sflag [#allocation3], %s213_s28 }
  0x1a   : > { %s220_s11 = scalar_lea.vmem %s974_s0, %s626_s7  ;;  %s225_s24 = scalar_lea.vmem %s975_s1, %s586_s8 }
  0x1b   : > { %v238_v0 = vld [vmem:[%s220_s11] sm:$0xf]  ;;  %v599_v2 = vld [vmem:[%s220_s11 + $0x4] sm:$0xf]  ;;  %v608_v3 = vld [vmem:[%s220_s11 + $0x8] sm:$0xf] }
  0x1c   : > { %v239_v1 = vpack.c.bf16 %v238_v0, %v238_v0  ;;  %v317_v4 = vpack.c.bf16 %v599_v2, %v599_v2  ;;  %v374_v5 = vpack.c.bf16 %v608_v3, %v608_v3  ;;  %v621_v7 = vld [vmem:[%s225_s24] sm:$0xff]  ;;  %v622_v8 = vld [vmem:[%s225_s24 + $0x8] sm:$0xff]  ;;  %355 = vmatpush.bf16.msrb.mxu3 %v289_v12  ;;  %412 = vmatpush.bf16.msrb.mxu1 %v289_v12 }
  0x1e   : > { %v259_v6 = vsel %vm257_vm0, %v239_v1, 0  ;;  %v319_v9 = vsel %vm257_vm0, %v317_v4, 0  ;;  %v376_v10 = vsel %vm257_vm0, %v374_v5, 0 }
  0x1f   : > { %268 = vmatpush.bf16.msra.mxu0 %v259_v6  ;;  %623 = vmatpush.bf16.msra.mxu2 %v259_v6 }
  0x22   : > { %595 = vmatmul.msk.bf16.vlgmr.msra.gmra.mxu0 %vm250_vm1, %v621_v7  ;;  %596 = vmatmul.msk.bf16.vlgmr.msra.gmra.mxu2 %vm250_vm1, %v622_v8 }
  0x23   : > { %328 = vmatpush.bf16.msrb.mxu2 %v319_v9  ;;  %385 = vmatpush.bf16.msrb.mxu0 %v376_v10 }
  0x32   : > { %600 = vmatmul.msk.bf16.vlgmr.msrb.gmra.mxu2 %vm250_vm1, %v621_v7  ;;  %609 = vmatmul.msk.bf16.vlgmr.msrb.gmra.mxu0 %vm250_vm1, %v621_v7 }
  0x42   : > { %601 = vmatmul.msk.bf16.gmra.mxu2 %vm250_vm1, %v622_v8  ;;  %610 = vmatmul.msk.bf16.gmra.mxu0 %vm250_vm1, %v622_v8 }
  0x9f   : > { %v270_v13 = vpop.f32.mrf.mxu0 }
  0xa5   : > { %v275_v14 = vpop.f32.mrf.mxu2 }
  0xa7   : > { %v272_v15 = vpop.f32.mrf.mxu0 }
  0xa8   : > { %v280_v16 = vpack.c.bf16 %v272_v15, %v270_v13 }
  0xaa   : > { %597 = vmatmul.msk.bf16.vlgmr.msra.gmra.mxu1 %vm250_vm1, %v280_v16 }
  0xad   : > { %v277_v17 = vpop.f32.mrf.mxu2 }
  0xae   : > { %v281_v18 = vpack.c.bf16 %v277_v17, %v275_v14 }
  0xaf   : > { %v387_v19 = vpop.f32.mrf.mxu0 }
  0xb0   : > { %598 = vmatmul.msk.bf16.vlgmr.msra.gmra.mxu3 %vm250_vm1, %v281_v18 }
  0xb5   : > { %v330_v20 = vpop.f32.mrf.mxu2 }
  0xb7   : > { %v389_v21 = vpop.f32.mrf.mxu0 }
  0xb8   : > { %v397_v22 = vpack.c.bf16 %v389_v21, %v387_v19 }
  0xba   : > { %611 = vmatmul.msk.bf16.vlgmr.msrb.gmra.mxu1 %vm250_vm1, %v397_v22 }
  0xbd   : > { %v332_v23 = vpop.f32.mrf.mxu2 }
  0xbe   : > { %v340_v24 = vpack.c.bf16 %v332_v23, %v330_v20 }
  0xbf   : > { %v392_v25 = vpop.f32.mrf.mxu0 }
  0xc0   : > { %602 = vmatmul.msk.bf16.vlgmr.msrb.gmra.mxu3 %vm250_vm1, %v340_v24 }
  0xc5   : > { %v335_v26 = vpop.f32.mrf.mxu2 }
  0xc7   : > { %v394_v27 = vpop.f32.mrf.mxu0 }
  0xc8   : > { %v398_v28 = vpack.c.bf16 %v394_v27, %v392_v25 }
  0xca   : > { %612 = vmatmul.msk.bf16.gmra.mxu1 %vm250_vm1, %v398_v28 }
  0xcd   : > { %v337_v29 = vpop.f32.mrf.mxu2 }
  0xce   : > { %v341_v30 = vpack.c.bf16 %v337_v29, %v335_v26 }
  0xd0   : > { %603 = vmatmul.msk.bf16.gmra.mxu3 %vm250_vm1, %v341_v30 }
 0x127   : > { %v300_v31 = vpop.f32.mrf.mxu1 }
 0x128   : > { %311 = vst.msk [vmem:[%s215_s5] sm:$0xff] %vm310_vm2, %v300_v31 }
 0x12f   : > { %v302_v32 = vpop.f32.mrf.mxu1 }
 0x130   : > { %312 = vst.msk [vmem:[%s215_s5 + $0x8] sm:$0xff] %vm310_vm2, %v302_v32 }
 0x133   : > { %v305_v33 = vpop.f32.mrf.mxu3 }
 0x134   : > { %313 = vst.msk [vmem:[%s215_s5 + $0x10] sm:$0xff] %vm310_vm2, %v305_v33 }
 0x137   : > { %v414_v34 = vpop.f32.mrf.mxu1 }
 0x138   : > { %613 = vst.msk [vmem:[%s215_s5 + $0x40] sm:$0xff] %vm310_vm2, %v414_v34 }
 0x13b   : > { %v307_v35 = vpop.f32.mrf.mxu3 }
 0x13c   : > { %314 = vst.msk [vmem:[%s215_s5 + $0x18] sm:$0xff] %vm310_vm2, %v307_v35 }
 0x13f   : > { %v416_v36 = vpop.f32.mrf.mxu1 }
 0x140   : > { %614 = vst.msk [vmem:[%s215_s5 + $0x48] sm:$0xff] %vm310_vm2, %v416_v36 }
 0x143   : > { %v357_v37 = vpop.f32.mrf.mxu3 }
 0x144   : > { %604 = vst.msk [vmem:[%s215_s5 + $0x20] sm:$0xff] %vm310_vm2, %v357_v37 }
 0x147   : > { %v419_v38 = vpop.f32.mrf.mxu1 }
 0x148   : > { %615 = vst.msk [vmem:[%s215_s5 + $0x50] sm:$0xff] %vm310_vm2, %v419_v38 }
 0x14b   : > { %v359_v39 = vpop.f32.mrf.mxu3 }
 0x14c   : > { %605 = vst.msk [vmem:[%s215_s5 + $0x28] sm:$0xff] %vm310_vm2, %v359_v39 }
 0x14f   : > { %v421_v40 = vpop.f32.mrf.mxu1 }
 0x150   : > { %616 = vst.msk [vmem:[%s215_s5 + $0x58] sm:$0xff] %vm310_vm2, %v421_v40 }
 0x153   : > { %v362_v41 = vpop.f32.mrf.mxu3 }
 0x154   : > { %606 = vst.msk [vmem:[%s215_s5 + $0x30] sm:$0xff] %vm310_vm2, %v362_v41 }
 0x15b   : > { %v364_v42 = vpop.f32.mrf.mxu3 }
 0x15c   : > { %607 = vst.msk [vmem:[%s215_s5 + $0x38] sm:$0xff] %vm310_vm2, %v364_v42 }
 0x15d   : > { %s627_s7 = smul.u32 24, %s766_s16  ;;  %s455_s8 = sshll.u32 %s215_s5, 4  ;;  %s456_s8 = int_to_ptr.vmem [resolvable:$true] %s455_s8 }
 0x15e   : > { %s780_s10 = smov 512   ;;  %s781_s15 = smov 1024  }
 0x15f   : > { %s442_s9 = sadd.s32 %s627_s7, %s880_s4  ;;  %628 = sst [smem:[#allocation5]] (%p858_p3), %s780_s10 }
 0x160   : > { %s618_s11 = sshll.u32 %s442_s9, 3  ;;  %629 = sst [smem:[#allocation5 + $0x1]] (%p858_p3), %s781_s15 }
 0x161   : > { %s444_s24 = scalar_lea.hbm %s977_s3, %s618_s11  ;;  %s782_s16 = smov 4  }
 0x162   : > { %s457_s27 = sshll.u32 %s444_s24, 4  ;;  %630 = sst [smem:[#allocation5 + $0x2]] (%p858_p3), %s782_s16  ;;  %s458_s27 = int_to_ptr.hbm [resolvable:$true] %s457_s27 }
 0x163   : > { %s783_s28 = smov 128   ;;  %s784_s4 = smov 8  }
 0x164   : > { %631 = sst [smem:[#allocation5 + $0x3]] (%p858_p3), %s783_s28  ;;  %s785_s29 = smov [#allocation4]  }
 0x165   : > { %632 = sst [smem:[#allocation5 + $0x4]] (%p858_p3), %s783_s28  ;;  %s786_s5 = smov 0  }
 0x166   : > { %633 = sst [smem:[#allocation5 + $0x5]] (%p858_p3), %s784_s4 }
 0x167   : > { %634 = dma.general (%p858_p3), %s456_s8, 1536, %s458_s27, %s430_s6, %s785_s29, [#allocation5], %s786_s5, 0  }
 0x168 PF: > { %p640_p0 = scmp.ge.s32.totalorder %s778_s19, 2  ;;  %s485_s7 = sand.u32 1, %s750_s12  }
 0x169   : > { %s486_s9 = scalar_lea.sflag [#allocation3], %s485_s7 }
 0x16a   : > { %p637_p1 = pnand %p640_p0, %p867_p8 }
 0x16c   : > { %p638_p2 = pneg %p637_p1 }
 0x16e   : > { %745 = dma.done.wait (%p638_p2), %s486_s9, 1536  }
 0x16f   : > { %747 = vsyncadd (%p638_p2), %s486_s9, 4294965760  ;;  %s16_s19 = sadd.s32 1, %s778_s19   ;;  %s980_s12 = smov %s754_s13 }
 0x170   : > { %p13_p4 = scmp.ge.s32.totalorder %s16_s19, 6   ;;  %s981_s13 = smov %s758_s14 }
 0x171   : > { %s982_s14 = smov %s876_s30  ;;  %s983_s15 = smov %s770_s17 }
 0x172   : > { %s984_s16 = smov %s774_s18  ;;  %s985_s17 = smov %s988_s22 }
 0x173   : > { %s986_s18 = smov %s992_s23  ;;  %15 = sbr.rel (!%p13_p4) target bundleno = 5 (0x5), region = 82 }
 0x178   :  { %492 = vsyncpa [#allocation3], 1 }
 0x179   :  { %494 = vsyncpa [#allocation3 + $0x1], 1 }

</bundles_post_ra>
